<compile_context>
chip_gen: v7x
topology: tpu7x:2x2x1
jax: 0.10.0
libtpu: 0.0.40
codegen_flags: <defaults>
</compile_context>

<pallas_src>
import functools
import types
from typing import NamedTuple, Optional, Tuple

import jax
import jax.numpy as jnp
from jax.experimental import pallas as pl
from jax.experimental.pallas import tpu as pltpu

BN_EPS = 1e-5      # PyTorch BatchNorm1d default eps
STD_EPS = 1e-7     # from DualVAE.reparameterize


class DualVAEConfig(NamedTuple):
  x_dim: int
  y_dim: int
  zx_dim: int
  zy_dim: int
  s_dim: int
  enc_h0: int
  enc_h1: int
  dec_h0: int
  dec_h1: int


def _round_up(v, m):
  return ((v + m - 1) // m) * m


def _dims(cfg: DualVAEConfig):
  """All derived static sizes and slab row offsets."""
  lat_x = cfg.zx_dim + cfg.s_dim
  lat_y = cfg.zy_dim + cfg.s_dim
  L = lat_x + lat_y                          # packed latent  [lat_x | lat_y]
  DIN = cfg.x_dim + cfg.y_dim                # packed encoder input [x | y]
  DIN_P = _round_up(DIN, 8)
  H0, H1 = 2 * cfg.enc_h0, 2 * cfg.enc_h1    # fused (X|Y) encoder hidden
  H0_P, H1_P, L_P = _round_up(H0, 8), _round_up(H1, 8), _round_up(L, 8)
  HEAD = 2 * L                               # [mu_x|mu_y | lv_x|lv_y]
  EW = _round_up(max(H0, H1, HEAD), 128)     # encoder slab lane width
  e_w1 = 0
  e_w2 = e_w1 + DIN_P
  e_w3 = e_w2 + H0_P
  e_wh = e_w3 + H1_P
  e_vec = e_wh + L_P
  ENC_ROWS = e_vec + 8
  DH0, DH1 = 2 * cfg.dec_h0, 2 * cfg.dec_h1  # fused (X|Y) decoder hidden
  DH0_P, DH1_P = _round_up(DH0, 8), _round_up(DH1, 8)
  DOUT = DIN                                 # packed decoder output [x | y]
  DW = _round_up(max(DH0, DH1, DOUT), 128)   # decoder slab lane width
  d_w1 = 0
  d_w2 = d_w1 + L_P
  d_w3 = d_w2 + DH0_P
  d_vec = d_w3 + DH1_P
  DEC_ROWS = d_vec + 8
  OW = _round_up(max(DOUT + 3 * L, 128), 128)  # lane-dense output slab width
  DATA_W = DIN_P + L                           # [x | y | pad | eps]
  ns = dict(locals())
  ns.pop("cfg")
  return types.SimpleNamespace(**ns)


# ----------------------------------------------------------------------------
# In-kernel helpers
# ----------------------------------------------------------------------------
def _bn_relu(h, gamma, beta):
  """Training-mode BatchNorm1d (batch mean, biased batch var) + ReLU."""
  mean = jnp.mean(h, axis=0, keepdims=True)
  var = jnp.mean(jnp.square(h - mean), axis=0, keepdims=True)
  hn = (h - mean) * jax.lax.rsqrt(var + BN_EPS)
  return jnp.maximum(gamma * hn + beta, 0.0)


def _bn_relu_grouped(h, gamma, beta, n_variants, batch):
  """Per-variant BN: row blocks [v*B:(v+1)*B] are independent batches."""
  hfeat = h.shape[-1]
  hg = h.reshape(n_variants, batch, hfeat)
  mean = jnp.mean(hg, axis=1, keepdims=True)
  var = jnp.mean(jnp.square(hg - mean), axis=1, keepdims=True)
  hn = (hg - mean) * jax.lax.rsqrt(var + BN_EPS)
  out = jnp.maximum(
      gamma.reshape(1, 1, hfeat) * hn + beta.reshape(1, 1, hfeat), 0.0)
  return out.reshape(n_variants * batch, hfeat)


# ----------------------------------------------------------------------------
# Fused forward kernel (single pallas_call, 3 input DMAs, 1 output DMA)
# ----------------------------------------------------------------------------
def _dual_vae_kernel(data_ref, enc_ref, dec_ref, out_ref, *, cfg, zero_vars):
  d = _dims(cfg)
  f32 = jnp.float32
  B = data_ref.shape[0]
  zx, zy = cfg.zx_dim, cfg.zy_dim
  Lx, Ly, L = d.lat_x, d.lat_y, d.L

  data = data_ref[...]
  xy = data[:, :d.DIN_P]                       # [x | y | 0-pad]
  eps = data[:, d.DIN_P:d.DIN_P + L]           # [eps_x | eps_y]

  # ---- fused encoders (X & Y side-by-side; block-diagonal weights) ---------
  w1 = enc_ref[d.e_w1:d.e_w1 + d.DIN_P, 0:d.H0]
  w2 = enc_ref[d.e_w2:d.e_w2 + d.H0, 0:d.H1]
  w3 = enc_ref[d.e_w3:d.e_w3 + d.H1, 0:L]
  wh = enc_ref[d.e_wh:d.e_wh + L, 0:d.HEAD]
  ev = enc_ref[d.e_vec:d.e_vec + 8, :]
  b1, g1, be1 = ev[0:1, :d.H0], ev[1:2, :d.H0], ev[2:3, :d.H0]
  b2, g2, be2 = ev[3:4, :d.H1], ev[4:5, :d.H1], ev[5:6, :d.H1]
  b3, bh = ev[6:7, :L], ev[7:8, :d.HEAD]

  h = _bn_relu(jnp.dot(xy, w1, preferred_element_type=f32) + b1, g1, be1)
  h = _bn_relu(jnp.dot(h, w2, preferred_element_type=f32) + b2, g2, be2)
  z = jnp.dot(h, w3, preferred_element_type=f32) + b3
  head = jnp.dot(z, wh, preferred_element_type=f32) + bh     # [mu | logvar]
  mu, lv = head[:, :L], head[:, L:d.HEAD]

  # ---- reparameterize (exp goes to the EUP) ---------------------------------
  samp = mu + eps * (jnp.exp(0.5 * lv) + STD_EPS)

  # lane masks over the packed latent [z_x | s_x | z_y | s_y]
  li = jax.lax.broadcasted_iota(jnp.int32, (B, L), 1)
  is_zx = li < zx
  is_sx = (li >= zx) & (li < Lx)
  is_zy = (li >= Lx) & (li < Lx + zy)
  is_sy = li >= Lx + zy

  # static zero_vars == VAEOutput.set_latent_zero before decoding
  if zero_vars:
    if "z_x" in zero_vars:
      samp = jnp.where(is_zx, 0.0, samp)
    if "s_x" in zero_vars:
      samp = jnp.where(is_sx, 0.0, samp)
    if "z_y" in zero_vars:
      samp = jnp.where(is_zy, 0.0, samp)
    if "s_y" in zero_vars:
      samp = jnp.where(is_sy, 0.0, samp)

  # ---- decoder-variant row blocks (variants folded into the batch axis) ----
  blk0 = samp                                   # X:[z_x|s_x]   Y:[z_y|s_y]
  blk1 = jnp.where(is_zx | is_zy, 0.0, samp)    # X:[ 0 |s_x]   Y:[ 0 |s_y]
  blk2 = jnp.where(is_sx | is_sy, 0.0, samp)    # X:[z_x| 0 ]   Y:[z_y| 0 ]
  s_y_vals = samp[:, Lx + zy:L]                 # (B, s) -- no selection matmul
  blk3_parts = []                               # X:[ 0 |s_y]   Y: dummy zeros
  if zx > 0:
    blk3_parts.append(jnp.zeros((B, zx), f32))
  blk3_parts.append(s_y_vals)
  blk3_parts.append(jnp.zeros((B, Ly), f32))
  blk3 = jnp.concatenate(blk3_parts, axis=1)
  dec_in = jnp.concatenate([blk0, blk1, blk2, blk3], axis=0)   # (4B, L)

  # ---- fused decoders (block-diagonal weights; per-variant BN stats) -------
  wd1 = dec_ref[d.d_w1:d.d_w1 + L, 0:d.DH0]
  wd2 = dec_ref[d.d_w2:d.d_w2 + d.DH0, 0:d.DH1]
  wd3 = dec_ref[d.d_w3:d.d_w3 + d.DH1, 0:d.DOUT]
  dv = dec_ref[d.d_vec:d.d_vec + 8, :]
  db1, dg1, dbe1 = dv[0:1, :d.DH0], dv[1:2, :d.DH0], dv[2:3, :d.DH0]
  db2, dg2, dbe2 = dv[3:4, :d.DH1], dv[4:5, :d.DH1], dv[5:6, :d.DH1]
  db3 = dv[6:7, :d.DOUT]

  hd = jnp.dot(dec_in, wd1, preferred_element_type=f32) + db1
  hd = _bn_relu_grouped(hd, dg1, dbe1, 4, B)
  hd = jnp.dot(hd, wd2, preferred_element_type=f32) + db2
  hd = _bn_relu_grouped(hd, dg2, dbe2, 4, B)
  recon = jnp.dot(hd, wd3, preferred_element_type=f32) + db3   # (4B, DOUT)

  # ---- one lane-dense output slab: [recon | mu|lv|samp | 0-pad] ------------
  enc_out = jnp.concatenate([mu, lv, samp], axis=1)            # (B, 3L)
  enc_full = jnp.concatenate(
      [enc_out, jnp.zeros((3 * B, 3 * L), f32)], axis=0)       # (4B, 3L)
  pieces = [recon, enc_full]
  pad_w = d.OW - d.DOUT - 3 * L
  if pad_w > 0:
    pieces.append(jnp.zeros((4 * B, pad_w), f32))
  out_ref[...] = jnp.concatenate(pieces, axis=1)               # (4B, OW)


# ----------------------------------------------------------------------------
# pallas_call wrapper
# ----------------------------------------------------------------------------
def _dual_vae_pallas(data, enc_slab, dec_slab, cfg, zero_vars):
  d = _dims(cfg)
  B = data.shape[0]
  kernel = functools.partial(_dual_vae_kernel, cfg=cfg, zero_vars=zero_vars)
  return pl.pallas_call(
      kernel,
      grid=(1,),
      in_specs=[
          pl.BlockSpec(data.shape, lambda i: (0, 0)),
          pl.BlockSpec(enc_slab.shape, lambda i: (0, 0)),
          pl.BlockSpec(dec_slab.shape, lambda i: (0, 0)),
      ],
      out_specs=pl.BlockSpec((4 * B, d.OW), lambda i: (0, 0)),
      out_shape=jax.ShapeDtypeStruct((4 * B, d.OW), jnp.float32),
      compiler_params=pltpu.CompilerParams(
          dimension_semantics=("arbitrary",)),
  )(data, enc_slab, dec_slab)


def set_zero_vars(input_dict, zero_vars=None):
  if zero_vars is None:
    return input_dict
  assert all(v in input_dict for v in zero_vars)
  return {k: (jnp.zeros_like(v) if k in zero_vars else v)
          for k, v in input_dict.items()}


@functools.partial(jax.jit, static_argnames=("cfg", "zero_vars"))
def _forward_impl(x, y, eps, params, *, cfg: DualVAEConfig,
                  zero_vars: Optional[Tuple[str, ...]]):
  d = _dims(cfg)
  B = x.shape[0]
  # NOTE: B should be a multiple of 8 (sublane) to keep all in-kernel
  # row-stacking relayout-free; other values still run correctly.

  # pack [x | y | 0-pad | eps] into one lane-dense data slab (1 input DMA)
  parts = [x, y]
  if d.DIN_P > d.DIN:
    parts.append(jnp.zeros((B, d.DIN_P - d.DIN), jnp.float32))
  parts.append(eps)
  data = jnp.concatenate(parts, axis=1)

  out = _dual_vae_pallas(data, params["enc_slab"], params["dec_slab"],
                         cfg, zero_vars)

  zx, zy = cfg.zx_dim, cfg.zy_dim
  Lx, L = d.lat_x, d.L

  rx = out[:, :cfg.x_dim]
  ry = out[:, cfg.x_dim:d.DOUT]
  recon = {"x": rx[0:B], "x_s": rx[B:2 * B], "x_zx": rx[2 * B:3 * B],
           "x_s1": rx[3 * B:4 * B],
           "y": ry[0:B], "y_s": ry[B:2 * B], "y_zy": ry[2 * B:3 * B]}

  enc = out[0:B, d.DOUT:d.DOUT + 3 * L]
  mu, lv, sp = enc[:, 0:L], enc[:, L:2 * L], enc[:, 2 * L:3 * L]

  def _split(v):
    return {"z_x": v[:, 0:zx], "s_x": v[:, zx:Lx],
            "z_y": v[:, Lx:Lx + zy], "s_y": v[:, Lx + zy:L]}

  zv = list(zero_vars) if zero_vars else None
  mean = set_zero_vars(_split(mu), zv)
  logvar = set_zero_vars(_split(lv), zv)
  sample = set_zero_vars(_split(sp), zv)   # already zeroed in-kernel; harmless
  return mean, logvar, sample, recon


# ----------------------------------------------------------------------------
# Parameter init: PyTorch-style uniform fan-in init, packed into two slabs
# ----------------------------------------------------------------------------
def _linear_params(key, in_dim, out_dim):
  kw, kb = jax.random.split(key)
  scale = 1.0 / float(in_dim) ** 0.5
  w = jax.random.uniform(kw, (in_dim, out_dim), jnp.float32, -scale, scale)
  b = jax.random.uniform(kb, (out_dim,), jnp.float32, -scale, scale)
  return w, b


def _put(slab, r, c, mat):
  return slab.at[r:r + mat.shape[0], c:c + mat.shape[1]].set(mat)


def _vrow(width, entries):
  row = jnp.zeros((width,), jnp.float32)
  for c, v in entries:
    row = row.at[c:c + v.shape[0]].set(v)
  return row


def _build_encoder_slab(key_x, key_y, cfg):
  """Both encoders as block-diagonal weights in one padded (rows, EW) slab."""
  d = _dims(cfg)
  h0, h1 = cfg.enc_h0, cfg.enc_h1
  Lx, Ly, L = d.lat_x, d.lat_y, d.L
  kx = jax.random.split(key_x, 5)
  ky = jax.random.split(key_y, 5)
  w1x, b1x = _linear_params(kx[0], cfg.x_dim, h0)
  w2x, b2x = _linear_params(kx[1], h0, h1)
  w3x, b3x = _linear_params(kx[2], h1, Lx)
  wmx, bmx = _linear_params(kx[3], Lx, Lx)
  wvx, bvx = _linear_params(kx[4], Lx, Lx)
  w1y, b1y = _linear_params(ky[0], cfg.y_dim, h0)
  w2y, b2y = _linear_params(ky[1], h0, h1)
  w3y, b3y = _linear_params(ky[2], h1, Ly)
  wmy, bmy = _linear_params(ky[3], Ly, Ly)
  wvy, bvy = _linear_params(ky[4], Ly, Ly)

  slab = jnp.zeros((d.ENC_ROWS, d.EW), jnp.float32)
  slab = _put(slab, d.e_w1, 0, w1x)
  slab = _put(slab, d.e_w1 + cfg.x_dim, h0, w1y)
  slab = _put(slab, d.e_w2, 0, w2x)
  slab = _put(slab, d.e_w2 + h0, h1, w2y)
  slab = _put(slab, d.e_w3, 0, w3x)
  slab = _put(slab, d.e_w3 + h1, Lx, w3y)
  # merged mu|logvar head: output lanes [0:L]=mu, [L:2L]=logvar (X then Y)
  slab = _put(slab, d.e_wh, 0, wmx)
  slab = _put(slab, d.e_wh, L, wvx)
  slab = _put(slab, d.e_wh + Lx, Lx, wmy)
  slab = _put(slab, d.e_wh + Lx, L + Lx, wvy)

  ones0 = jnp.ones((d.H0,), jnp.float32)
  ones1 = jnp.ones((d.H1,), jnp.float32)
  vec = jnp.stack([
      _vrow(d.EW, [(0, b1x), (h0, b1y)]),                        # bias 1
      _vrow(d.EW, [(0, ones0)]),                                 # gamma 1
      _vrow(d.EW, []),                                           # beta 1
      _vrow(d.EW, [(0, b2x), (h1, b2y)]),                        # bias 2
      _vrow(d.EW, [(0, ones1)]),                                 # gamma 2
      _vrow(d.EW, []),                                           # beta 2
      _vrow(d.EW, [(0, b3x), (Lx, b3y)]),                        # bias 3
      _vrow(d.EW, [(0, bmx), (Lx, bmy), (L, bvx), (L + Lx, bvy)]),  # head bias
  ])
  return slab.at[d.e_vec:d.e_vec + 8, :].set(vec)


def _build_decoder_slab(key_x, key_y, cfg):
  """Both decoders as block-diagonal weights in one padded (rows, DW) slab."""
  d = _dims(cfg)
  h0, h1 = cfg.dec_h0, cfg.dec_h1          # already the reversed hidden dims
  Lx, Ly = d.lat_x, d.lat_y
  kx = jax.random.split(key_x, 3)
  ky = jax.random.split(key_y, 3)
  w1x, b1x = _linear_params(kx[0], Lx, h0)
  w2x, b2x = _linear_params(kx[1], h0, h1)
  w3x, b3x = _linear_params(kx[2], h1, cfg.x_dim)
  w1y, b1y = _linear_params(ky[0], Ly, h0)
  w2y, b2y = _linear_params(ky[1], h0, h1)
  w3y, b3y = _linear_params(ky[2], h1, cfg.y_dim)

  slab = jnp.zeros((d.DEC_ROWS, d.DW), jnp.float32)
  slab = _put(slab, d.d_w1, 0, w1x)
  slab = _put(slab, d.d_w1 + Lx, h0, w1y)
  slab = _put(slab, d.d_w2, 0, w2x)
  slab = _put(slab, d.d_w2 + h0, h1, w2y)
  slab = _put(slab, d.d_w3, 0, w3x)
  slab = _put(slab, d.d_w3 + h1, cfg.x_dim, w3y)

  ones0 = jnp.ones((d.DH0,), jnp.float32)
  ones1 = jnp.ones((d.DH1,), jnp.float32)
  vec = jnp.stack([
      _vrow(d.DW, [(0, b1x), (h0, b1y)]),
      _vrow(d.DW, [(0, ones0)]),
      _vrow(d.DW, []),
      _vrow(d.DW, [(0, b2x), (h1, b2y)]),
      _vrow(d.DW, [(0, ones1)]),
      _vrow(d.DW, []),
      _vrow(d.DW, [(0, b3x), (cfg.x_dim, b3y)]),
      _vrow(d.DW, []),                                           # padding row
  ])
  return slab.at[d.d_vec:d.d_vec + 8, :].set(vec)


# ----------------------------------------------------------------------------
# DualVAE wrapper
# ----------------------------------------------------------------------------
class VAEOutput:
  def __init__(self, mean, logvar, sample, recon=None):
    self.mean, self.logvar, self.sample, self.recon = mean, logvar, sample, recon


class DualVAEPallas:
  def __init__(self, x_dim, y_dim, zx_dim=2, zy_dim=2, s_dim=2,
               hidden_dims=(32, 32), seed=0):
    hd = list(hidden_dims)
    assert len(hd) == 2, "this kernel supports exactly two hidden layers"
    rhd = hd[::-1]
    self.cfg = DualVAEConfig(x_dim=x_dim, y_dim=y_dim, zx_dim=zx_dim,
                             zy_dim=zy_dim, s_dim=s_dim,
                             enc_h0=hd[0], enc_h1=hd[1],
                             dec_h0=rhd[0], dec_h1=rhd[1])
    k = jax.random.split(jax.random.PRNGKey(seed), 4)
    self.params = {
        "enc_slab": _build_encoder_slab(k[0], k[2], self.cfg),
        "dec_slab": _build_decoder_slab(k[1], k[3], self.cfg),
    }

  def forward(self, x, y, rng_key, zero_vars=None):
    d = _dims(self.cfg)
    kx, ky = jax.random.split(rng_key)
    # eps drawn with jax.random (torch.randn_like equivalent)
    eps_x = jax.random.normal(kx, (x.shape[0], d.lat_x), jnp.float32)
    eps_y = jax.random.normal(ky, (y.shape[0], d.lat_y), jnp.float32)
    eps = jnp.concatenate([eps_x, eps_y], axis=1)
    zero_key = tuple(sorted(zero_vars)) if zero_vars else None
    mean, logvar, sample, recon = _forward_impl(
        x, y, eps, self.params, cfg=self.cfg, zero_vars=zero_key)
    return VAEOutput(mean, logvar, sample, recon)


# ----------------------------------------------------------------------------
if __name__ == "__main__":
  B, x_dim, y_dim = 8, 16, 16
  model = DualVAEPallas(x_dim, y_dim, zx_dim=2, zy_dim=2, s_dim=2,
                        hidden_dims=(32, 32), seed=0)

  key = jax.random.PRNGKey(0)
  kx, ky, keps = jax.random.split(key, 3)
  x = jax.random.normal(kx, (B, x_dim), jnp.float32)
  y = jax.random.normal(ky, (B, y_dim), jnp.float32)

  out = model.forward(x, y, keps)
  jax.tree_util.tree_map(jax.block_until_ready,
                         (out.mean, out.logvar, out.sample, out.recon))

  # sanity on shapes / values
  assert out.recon["x"].shape == (B, x_dim)
  assert out.recon["y"].shape == (B, y_dim)
  assert out.recon["x_s1"].shape == (B, x_dim)
  assert out.mean["z_x"].shape == (B, 2) and out.mean["s_y"].shape == (B, 2)
  assert out.sample["z_y"].shape == (B, 2) and out.logvar["s_x"].shape == (B, 2)
  assert all(bool(jnp.isfinite(v).all()) for v in out.recon.values())

  # zero_vars path (matches VAEOutput.set_latent_zero before decoding)
  out_z = model.forward(x, y, keps, zero_vars=("s_x",))
  jax.block_until_ready(out_z.recon["x"])
  assert bool((out_z.sample["s_x"] == 0).all())
  assert all(bool(jnp.isfinite(v).all()) for v in out_z.recon.values())

  print("KERNEL_OK")
</pallas_src>

<mosaic_0001>
module attributes {stable_mosaic.version = 11 : i64} {
  func.func @_dual_vae_kernel(%arg0: i32, %arg1: memref<8x40xf32, #tpu.memory_space<vmem>>, %arg2: memref<176x128xf32, #tpu.memory_space<vmem>>, %arg3: memref<144x128xf32, #tpu.memory_space<vmem>>, %arg4: memref<32x128xf32, #tpu.memory_space<vmem>>) attributes {dimension_semantics = [#tpu.dimension_semantics<arbitrary>], iteration_bounds = array<i64: 1>, scalar_prefetch = 0 : i64, scratch_operands = 0 : i64, tpu.core_type = #tpu.core_type<tc>, window_params = [{pipeline_mode = #tpu.pipeline_mode<synchronous>, transform_indices = @transform_0, window_bounds = array<i64: 8, 40>}, {pipeline_mode = #tpu.pipeline_mode<synchronous>, transform_indices = @transform_1, window_bounds = array<i64: 176, 128>}, {pipeline_mode = #tpu.pipeline_mode<synchronous>, transform_indices = @transform_2, window_bounds = array<i64: 144, 128>}, {pipeline_mode = #tpu.pipeline_mode<synchronous>, transform_indices = @transform_3, window_bounds = array<i64: 32, 128>}]} {
    %c0 = arith.constant 0 : index
    %c0_0 = arith.constant 0 : index
    %0 = vector.load %arg1[%c0, %c0_0] : memref<8x40xf32, #tpu.memory_space<vmem>>, vector<8x40xf32>
    %1 = vector.extract_strided_slice %0 {offsets = [0, 0], sizes = [8, 32], strides = [1, 1]} : vector<8x40xf32> to vector<8x32xf32>
    %2 = vector.extract_strided_slice %0 {offsets = [0, 32], sizes = [8, 8], strides = [1, 1]} : vector<8x40xf32> to vector<8x8xf32>
    %c0_1 = arith.constant 0 : index
    %c0_2 = arith.constant 0 : index
    %3 = vector.load %arg2[%c0_1, %c0_2] : memref<176x128xf32, #tpu.memory_space<vmem>>, vector<32x64xf32>
    %c32 = arith.constant 32 : index
    %c0_3 = arith.constant 0 : index
    %4 = vector.load %arg2[%c32, %c0_3] : memref<176x128xf32, #tpu.memory_space<vmem>>, vector<64x64xf32>
    %c96 = arith.constant 96 : index
    %c0_4 = arith.constant 0 : index
    %5 = vector.load %arg2[%c96, %c0_4] : memref<176x128xf32, #tpu.memory_space<vmem>>, vector<64x8xf32>
    %c160 = arith.constant 160 : index
    %c0_5 = arith.constant 0 : index
    %6 = vector.load %arg2[%c160, %c0_5] : memref<176x128xf32, #tpu.memory_space<vmem>>, vector<8x16xf32>
    %c168 = arith.constant 168 : index
    %c0_6 = arith.constant 0 : index
    %7 = vector.load %arg2[%c168, %c0_6] : memref<176x128xf32, #tpu.memory_space<vmem>>, vector<8x128xf32>
    %8 = vector.extract_strided_slice %7 {offsets = [0, 0], sizes = [1, 64], strides = [1, 1]} : vector<8x128xf32> to vector<1x64xf32>
    %9 = vector.extract_strided_slice %7 {offsets = [1, 0], sizes = [1, 64], strides = [1, 1]} : vector<8x128xf32> to vector<1x64xf32>
    %10 = vector.extract_strided_slice %7 {offsets = [2, 0], sizes = [1, 64], strides = [1, 1]} : vector<8x128xf32> to vector<1x64xf32>
    %11 = vector.extract_strided_slice %7 {offsets = [3, 0], sizes = [1, 64], strides = [1, 1]} : vector<8x128xf32> to vector<1x64xf32>
    %12 = vector.extract_strided_slice %7 {offsets = [4, 0], sizes = [1, 64], strides = [1, 1]} : vector<8x128xf32> to vector<1x64xf32>
    %13 = vector.extract_strided_slice %7 {offsets = [5, 0], sizes = [1, 64], strides = [1, 1]} : vector<8x128xf32> to vector<1x64xf32>
    %14 = vector.extract_strided_slice %7 {offsets = [6, 0], sizes = [1, 8], strides = [1, 1]} : vector<8x128xf32> to vector<1x8xf32>
    %15 = vector.extract_strided_slice %7 {offsets = [7, 0], sizes = [1, 16], strides = [1, 1]} : vector<8x128xf32> to vector<1x16xf32>
    %cst = arith.constant dense<0.000000e+00> : vector<8x64xf32>
    %16 = tpu.matmul %1, %3, %cst {dimension_numbers = #tpu.dot_dimension_numbers<[1], [0], [0], [1], [0, 0, 1, 1], [], []>} : vector<8x32xf32>, vector<32x64xf32>, vector<8x64xf32> -> vector<8x64xf32>
    %17 = vector.broadcast %8 : vector<1x64xf32> to vector<8x64xf32>
    %18 = arith.addf %16, %17 : vector<8x64xf32>
    %cst_7 = arith.constant dense<0.000000e+00> : vector<64xf32>
    %19 = vector.multi_reduction <add>, %18, %cst_7 [0] : vector<8x64xf32> to vector<64xf32>
    %20 = vector.shape_cast %19 : vector<64xf32> to vector<1x64xf32>
    %cst_8 = arith.constant 8.000000e+00 : f32
    %21 = vector.broadcast %cst_8 : f32 to vector<1x64xf32>
    %22 = arith.divf %20, %21 : vector<1x64xf32>
    %23 = vector.broadcast %22 : vector<1x64xf32> to vector<8x64xf32>
    %24 = arith.subf %18, %23 : vector<8x64xf32>
    %25 = arith.mulf %24, %24 : vector<8x64xf32>
    %cst_9 = arith.constant dense<0.000000e+00> : vector<64xf32>
    %26 = vector.multi_reduction <add>, %25, %cst_9 [0] : vector<8x64xf32> to vector<64xf32>
    %27 = vector.shape_cast %26 : vector<64xf32> to vector<1x64xf32>
    %cst_10 = arith.constant 8.000000e+00 : f32
    %28 = vector.broadcast %cst_10 : f32 to vector<1x64xf32>
    %29 = arith.divf %27, %28 : vector<1x64xf32>
    %30 = vector.broadcast %22 : vector<1x64xf32> to vector<8x64xf32>
    %31 = arith.subf %18, %30 : vector<8x64xf32>
    %cst_11 = arith.constant 9.99999974E-6 : f32
    %32 = vector.broadcast %cst_11 : f32 to vector<1x64xf32>
    %33 = arith.addf %29, %32 : vector<1x64xf32>
    %34 = math.rsqrt %33 : vector<1x64xf32>
    %35 = vector.broadcast %34 : vector<1x64xf32> to vector<8x64xf32>
    %36 = arith.mulf %31, %35 : vector<8x64xf32>
    %37 = vector.broadcast %9 : vector<1x64xf32> to vector<8x64xf32>
    %38 = arith.mulf %37, %36 : vector<8x64xf32>
    %39 = vector.broadcast %10 : vector<1x64xf32> to vector<8x64xf32>
    %40 = arith.addf %38, %39 : vector<8x64xf32>
    %cst_12 = arith.constant 0.000000e+00 : f32
    %41 = vector.broadcast %cst_12 : f32 to vector<8x64xf32>
    %42 = arith.maximumf %40, %41 : vector<8x64xf32>
    %cst_13 = arith.constant dense<0.000000e+00> : vector<8x64xf32>
    %43 = tpu.matmul %42, %4, %cst_13 {dimension_numbers = #tpu.dot_dimension_numbers<[1], [0], [0], [1], [0, 0, 1, 1], [], []>} : vector<8x64xf32>, vector<64x64xf32>, vector<8x64xf32> -> vector<8x64xf32>
    %44 = vector.broadcast %11 : vector<1x64xf32> to vector<8x64xf32>
    %45 = arith.addf %43, %44 : vector<8x64xf32>
    %cst_14 = arith.constant dense<0.000000e+00> : vector<64xf32>
    %46 = vector.multi_reduction <add>, %45, %cst_14 [0] : vector<8x64xf32> to vector<64xf32>
    %47 = vector.shape_cast %46 : vector<64xf32> to vector<1x64xf32>
    %cst_15 = arith.constant 8.000000e+00 : f32
    %48 = vector.broadcast %cst_15 : f32 to vector<1x64xf32>
    %49 = arith.divf %47, %48 : vector<1x64xf32>
    %50 = vector.broadcast %49 : vector<1x64xf32> to vector<8x64xf32>
    %51 = arith.subf %45, %50 : vector<8x64xf32>
    %52 = arith.mulf %51, %51 : vector<8x64xf32>
    %cst_16 = arith.constant dense<0.000000e+00> : vector<64xf32>
    %53 = vector.multi_reduction <add>, %52, %cst_16 [0] : vector<8x64xf32> to vector<64xf32>
    %54 = vector.shape_cast %53 : vector<64xf32> to vector<1x64xf32>
    %cst_17 = arith.constant 8.000000e+00 : f32
    %55 = vector.broadcast %cst_17 : f32 to vector<1x64xf32>
    %56 = arith.divf %54, %55 : vector<1x64xf32>
    %57 = vector.broadcast %49 : vector<1x64xf32> to vector<8x64xf32>
    %58 = arith.subf %45, %57 : vector<8x64xf32>
    %cst_18 = arith.constant 9.99999974E-6 : f32
    %59 = vector.broadcast %cst_18 : f32 to vector<1x64xf32>
    %60 = arith.addf %56, %59 : vector<1x64xf32>
    %61 = math.rsqrt %60 : vector<1x64xf32>
    %62 = vector.broadcast %61 : vector<1x64xf32> to vector<8x64xf32>
    %63 = arith.mulf %58, %62 : vector<8x64xf32>
    %64 = vector.broadcast %12 : vector<1x64xf32> to vector<8x64xf32>
    %65 = arith.mulf %64, %63 : vector<8x64xf32>
    %66 = vector.broadcast %13 : vector<1x64xf32> to vector<8x64xf32>
    %67 = arith.addf %65, %66 : vector<8x64xf32>
    %cst_19 = arith.constant 0.000000e+00 : f32
    %68 = vector.broadcast %cst_19 : f32 to vector<8x64xf32>
    %69 = arith.maximumf %67, %68 : vector<8x64xf32>
    %cst_20 = arith.constant dense<0.000000e+00> : vector<8x8xf32>
    %70 = tpu.matmul %69, %5, %cst_20 {dimension_numbers = #tpu.dot_dimension_numbers<[1], [0], [0], [1], [0, 0, 1, 1], [], []>} : vector<8x64xf32>, vector<64x8xf32>, vector<8x8xf32> -> vector<8x8xf32>
    %71 = vector.broadcast %14 : vector<1x8xf32> to vector<8x8xf32>
    %72 = arith.addf %70, %71 : vector<8x8xf32>
    %cst_21 = arith.constant dense<0.000000e+00> : vector<8x16xf32>
    %73 = tpu.matmul %72, %6, %cst_21 {dimension_numbers = #tpu.dot_dimension_numbers<[1], [0], [0], [1], [0, 0, 1, 1], [], []>} : vector<8x8xf32>, vector<8x16xf32>, vector<8x16xf32> -> vector<8x16xf32>
    %74 = vector.broadcast %15 : vector<1x16xf32> to vector<8x16xf32>
    %75 = arith.addf %73, %74 : vector<8x16xf32>
    %76 = vector.extract_strided_slice %75 {offsets = [0, 0], sizes = [8, 8], strides = [1, 1]} : vector<8x16xf32> to vector<8x8xf32>
    %77 = vector.extract_strided_slice %75 {offsets = [0, 8], sizes = [8, 8], strides = [1, 1]} : vector<8x16xf32> to vector<8x8xf32>
    %cst_22 = arith.constant 5.000000e-01 : f32
    %78 = vector.broadcast %cst_22 : f32 to vector<8x8xf32>
    %79 = arith.mulf %78, %77 : vector<8x8xf32>
    %80 = math.exp %79 : vector<8x8xf32>
    %cst_23 = arith.constant 1.000000e-07 : f32
    %81 = vector.broadcast %cst_23 : f32 to vector<8x8xf32>
    %82 = arith.addf %80, %81 : vector<8x8xf32>
    %83 = arith.mulf %2, %82 : vector<8x8xf32>
    %84 = arith.addf %76, %83 : vector<8x8xf32>
    %85 = tpu.iota {dimensions = array<i32: 1>} : vector<8x8xi32>
    %c2_i32 = arith.constant 2 : i32
    %86 = vector.broadcast %c2_i32 : i32 to vector<8x8xi32>
    %87 = arith.cmpi slt, %85, %86 : vector<8x8xi32>
    %c2_i32_24 = arith.constant 2 : i32
    %88 = vector.broadcast %c2_i32_24 : i32 to vector<8x8xi32>
    %89 = arith.cmpi sge, %85, %88 : vector<8x8xi32>
    %c4_i32 = arith.constant 4 : i32
    %90 = vector.broadcast %c4_i32 : i32 to vector<8x8xi32>
    %91 = arith.cmpi slt, %85, %90 : vector<8x8xi32>
    %92 = arith.andi %89, %91 : vector<8x8xi1>
    %c4_i32_25 = arith.constant 4 : i32
    %93 = vector.broadcast %c4_i32_25 : i32 to vector<8x8xi32>
    %94 = arith.cmpi sge, %85, %93 : vector<8x8xi32>
    %c6_i32 = arith.constant 6 : i32
    %95 = vector.broadcast %c6_i32 : i32 to vector<8x8xi32>
    %96 = arith.cmpi slt, %85, %95 : vector<8x8xi32>
    %97 = arith.andi %94, %96 : vector<8x8xi1>
    %c6_i32_26 = arith.constant 6 : i32
    %98 = vector.broadcast %c6_i32_26 : i32 to vector<8x8xi32>
    %99 = arith.cmpi sge, %85, %98 : vector<8x8xi32>
    %100 = arith.ori %87, %97 : vector<8x8xi1>
    %cst_27 = arith.constant 0.000000e+00 : f32
    %101 = vector.broadcast %cst_27 : f32 to vector<8x8xf32>
    %102 = arith.select %100, %101, %84 : vector<8x8xi1>, vector<8x8xf32>
    %103 = arith.ori %92, %99 : vector<8x8xi1>
    %cst_28 = arith.constant 0.000000e+00 : f32
    %104 = vector.broadcast %cst_28 : f32 to vector<8x8xf32>
    %105 = arith.select %103, %104, %84 : vector<8x8xi1>, vector<8x8xf32>
    %106 = vector.extract_strided_slice %84 {offsets = [0, 6], sizes = [8, 2], strides = [1, 1]} : vector<8x8xf32> to vector<8x2xf32>
    %cst_29 = arith.constant 0.000000e+00 : f32
    %107 = vector.broadcast %cst_29 : f32 to vector<8x2xf32>
    %cst_30 = arith.constant 0.000000e+00 : f32
    %108 = vector.broadcast %cst_30 : f32 to vector<8x4xf32>
    %109 = tpu.concatenate %107, %106, %108 in 1 : vector<8x2xf32>, vector<8x2xf32>, vector<8x4xf32> -> vector<8x8xf32>
    %110 = tpu.concatenate %84, %102, %105, %109 in 0 : vector<8x8xf32>, vector<8x8xf32>, vector<8x8xf32>, vector<8x8xf32> -> vector<32x8xf32>
    %c0_31 = arith.constant 0 : index
    %c0_32 = arith.constant 0 : index
    %111 = vector.load %arg3[%c0_31, %c0_32] : memref<144x128xf32, #tpu.memory_space<vmem>>, vector<8x64xf32>
    %c8 = arith.constant 8 : index
    %c0_33 = arith.constant 0 : index
    %112 = vector.load %arg3[%c8, %c0_33] : memref<144x128xf32, #tpu.memory_space<vmem>>, vector<64x64xf32>
    %c72 = arith.constant 72 : index
    %c0_34 = arith.constant 0 : index
    %113 = vector.load %arg3[%c72, %c0_34] : memref<144x128xf32, #tpu.memory_space<vmem>>, vector<64x32xf32>
    %c136 = arith.constant 136 : index
    %c0_35 = arith.constant 0 : index
    %114 = vector.load %arg3[%c136, %c0_35] : memref<144x128xf32, #tpu.memory_space<vmem>>, vector<8x128xf32>
    %115 = vector.extract_strided_slice %114 {offsets = [0, 0], sizes = [1, 64], strides = [1, 1]} : vector<8x128xf32> to vector<1x64xf32>
    %116 = vector.extract_strided_slice %114 {offsets = [1, 0], sizes = [1, 64], strides = [1, 1]} : vector<8x128xf32> to vector<1x64xf32>
    %117 = vector.extract_strided_slice %114 {offsets = [2, 0], sizes = [1, 64], strides = [1, 1]} : vector<8x128xf32> to vector<1x64xf32>
    %118 = vector.extract_strided_slice %114 {offsets = [3, 0], sizes = [1, 64], strides = [1, 1]} : vector<8x128xf32> to vector<1x64xf32>
    %119 = vector.extract_strided_slice %114 {offsets = [4, 0], sizes = [1, 64], strides = [1, 1]} : vector<8x128xf32> to vector<1x64xf32>
    %120 = vector.extract_strided_slice %114 {offsets = [5, 0], sizes = [1, 64], strides = [1, 1]} : vector<8x128xf32> to vector<1x64xf32>
    %121 = vector.extract_strided_slice %114 {offsets = [6, 0], sizes = [1, 32], strides = [1, 1]} : vector<8x128xf32> to vector<1x32xf32>
    %cst_36 = arith.constant dense<0.000000e+00> : vector<32x64xf32>
    %122 = tpu.matmul %110, %111, %cst_36 {dimension_numbers = #tpu.dot_dimension_numbers<[1], [0], [0], [1], [0, 0, 1, 1], [], []>} : vector<32x8xf32>, vector<8x64xf32>, vector<32x64xf32> -> vector<32x64xf32>
    %123 = vector.broadcast %115 : vector<1x64xf32> to vector<32x64xf32>
    %124 = arith.addf %122, %123 : vector<32x64xf32>
    %125 = vector.shape_cast %124 : vector<32x64xf32> to vector<4x8x64xf32>
    %cst_37 = arith.constant dense<0.000000e+00> : vector<4x64xf32>
    %126 = vector.multi_reduction <add>, %125, %cst_37 [1] : vector<4x8x64xf32> to vector<4x64xf32>
    %127 = vector.shape_cast %126 : vector<4x64xf32> to vector<4x1x64xf32>
    %cst_38 = arith.constant 8.000000e+00 : f32
    %128 = vector.broadcast %cst_38 : f32 to vector<4x1x64xf32>
    %129 = arith.divf %127, %128 : vector<4x1x64xf32>
    %130 = vector.broadcast %129 : vector<4x1x64xf32> to vector<4x8x64xf32>
    %131 = arith.subf %125, %130 : vector<4x8x64xf32>
    %132 = arith.mulf %131, %131 : vector<4x8x64xf32>
    %cst_39 = arith.constant dense<0.000000e+00> : vector<4x64xf32>
    %133 = vector.multi_reduction <add>, %132, %cst_39 [1] : vector<4x8x64xf32> to vector<4x64xf32>
    %134 = vector.shape_cast %133 : vector<4x64xf32> to vector<4x1x64xf32>
    %cst_40 = arith.constant 8.000000e+00 : f32
    %135 = vector.broadcast %cst_40 : f32 to vector<4x1x64xf32>
    %136 = arith.divf %134, %135 : vector<4x1x64xf32>
    %137 = vector.broadcast %129 : vector<4x1x64xf32> to vector<4x8x64xf32>
    %138 = arith.subf %125, %137 : vector<4x8x64xf32>
    %cst_41 = arith.constant 9.99999974E-6 : f32
    %139 = vector.broadcast %cst_41 : f32 to vector<4x1x64xf32>
    %140 = arith.addf %136, %139 : vector<4x1x64xf32>
    %141 = math.rsqrt %140 : vector<4x1x64xf32>
    %142 = vector.broadcast %141 : vector<4x1x64xf32> to vector<4x8x64xf32>
    %143 = arith.mulf %138, %142 : vector<4x8x64xf32>
    %144 = vector.shape_cast %116 : vector<1x64xf32> to vector<1x1x64xf32>
    %145 = vector.broadcast %144 : vector<1x1x64xf32> to vector<4x8x64xf32>
    %146 = arith.mulf %145, %143 : vector<4x8x64xf32>
    %147 = vector.shape_cast %117 : vector<1x64xf32> to vector<1x1x64xf32>
    %148 = vector.broadcast %147 : vector<1x1x64xf32> to vector<4x8x64xf32>
    %149 = arith.addf %146, %148 : vector<4x8x64xf32>
    %cst_42 = arith.constant 0.000000e+00 : f32
    %150 = vector.broadcast %cst_42 : f32 to vector<4x8x64xf32>
    %151 = arith.maximumf %149, %150 : vector<4x8x64xf32>
    %152 = vector.shape_cast %151 : vector<4x8x64xf32> to vector<32x64xf32>
    %cst_43 = arith.constant dense<0.000000e+00> : vector<32x64xf32>
    %153 = tpu.matmul %152, %112, %cst_43 {dimension_numbers = #tpu.dot_dimension_numbers<[1], [0], [0], [1], [0, 0, 1, 1], [], []>} : vector<32x64xf32>, vector<64x64xf32>, vector<32x64xf32> -> vector<32x64xf32>
    %154 = vector.broadcast %118 : vector<1x64xf32> to vector<32x64xf32>
    %155 = arith.addf %153, %154 : vector<32x64xf32>
    %156 = vector.shape_cast %155 : vector<32x64xf32> to vector<4x8x64xf32>
    %cst_44 = arith.constant dense<0.000000e+00> : vector<4x64xf32>
    %157 = vector.multi_reduction <add>, %156, %cst_44 [1] : vector<4x8x64xf32> to vector<4x64xf32>
    %158 = vector.shape_cast %157 : vector<4x64xf32> to vector<4x1x64xf32>
    %cst_45 = arith.constant 8.000000e+00 : f32
    %159 = vector.broadcast %cst_45 : f32 to vector<4x1x64xf32>
    %160 = arith.divf %158, %159 : vector<4x1x64xf32>
    %161 = vector.broadcast %160 : vector<4x1x64xf32> to vector<4x8x64xf32>
    %162 = arith.subf %156, %161 : vector<4x8x64xf32>
    %163 = arith.mulf %162, %162 : vector<4x8x64xf32>
    %cst_46 = arith.constant dense<0.000000e+00> : vector<4x64xf32>
    %164 = vector.multi_reduction <add>, %163, %cst_46 [1] : vector<4x8x64xf32> to vector<4x64xf32>
    %165 = vector.shape_cast %164 : vector<4x64xf32> to vector<4x1x64xf32>
    %cst_47 = arith.constant 8.000000e+00 : f32
    %166 = vector.broadcast %cst_47 : f32 to vector<4x1x64xf32>
    %167 = arith.divf %165, %166 : vector<4x1x64xf32>
    %168 = vector.broadcast %160 : vector<4x1x64xf32> to vector<4x8x64xf32>
    %169 = arith.subf %156, %168 : vector<4x8x64xf32>
    %cst_48 = arith.constant 9.99999974E-6 : f32
    %170 = vector.broadcast %cst_48 : f32 to vector<4x1x64xf32>
    %171 = arith.addf %167, %170 : vector<4x1x64xf32>
    %172 = math.rsqrt %171 : vector<4x1x64xf32>
    %173 = vector.broadcast %172 : vector<4x1x64xf32> to vector<4x8x64xf32>
    %174 = arith.mulf %169, %173 : vector<4x8x64xf32>
    %175 = vector.shape_cast %119 : vector<1x64xf32> to vector<1x1x64xf32>
    %176 = vector.broadcast %175 : vector<1x1x64xf32> to vector<4x8x64xf32>
    %177 = arith.mulf %176, %174 : vector<4x8x64xf32>
    %178 = vector.shape_cast %120 : vector<1x64xf32> to vector<1x1x64xf32>
    %179 = vector.broadcast %178 : vector<1x1x64xf32> to vector<4x8x64xf32>
    %180 = arith.addf %177, %179 : vector<4x8x64xf32>
    %cst_49 = arith.constant 0.000000e+00 : f32
    %181 = vector.broadcast %cst_49 : f32 to vector<4x8x64xf32>
    %182 = arith.maximumf %180, %181 : vector<4x8x64xf32>
    %183 = vector.shape_cast %182 : vector<4x8x64xf32> to vector<32x64xf32>
    %cst_50 = arith.constant dense<0.000000e+00> : vector<32x32xf32>
    %184 = tpu.matmul %183, %113, %cst_50 {dimension_numbers = #tpu.dot_dimension_numbers<[1], [0], [0], [1], [0, 0, 1, 1], [], []>} : vector<32x64xf32>, vector<64x32xf32>, vector<32x32xf32> -> vector<32x32xf32>
    %185 = vector.broadcast %121 : vector<1x32xf32> to vector<32x32xf32>
    %186 = arith.addf %184, %185 : vector<32x32xf32>
    %187 = tpu.concatenate %76, %77, %84 in 1 : vector<8x8xf32>, vector<8x8xf32>, vector<8x8xf32> -> vector<8x24xf32>
    %cst_51 = arith.constant 0.000000e+00 : f32
    %188 = vector.broadcast %cst_51 : f32 to vector<24x24xf32>
    %189 = tpu.concatenate %187, %188 in 0 : vector<8x24xf32>, vector<24x24xf32> -> vector<32x24xf32>
    %cst_52 = arith.constant 0.000000e+00 : f32
    %190 = vector.broadcast %cst_52 : f32 to vector<32x72xf32>
    %191 = tpu.concatenate %186, %189, %190 in 1 : vector<32x32xf32>, vector<32x24xf32>, vector<32x72xf32> -> vector<32x128xf32>
    %c0_53 = arith.constant 0 : index
    %c0_54 = arith.constant 0 : index
    %192 = vector.load %arg4[%c0_53, %c0_54] : memref<32x128xf32, #tpu.memory_space<vmem>>, vector<32x128xf32>
    tpu.vector_store %arg4[%c0_53, %c0_54], %191 {strides = array<i32>} : memref<32x128xf32, #tpu.memory_space<vmem>>, vector<32x128xf32>,
    return
  }
  func.func @transform_0(%arg0: i32) -> (i32, i32) {
    %c0_i32 = arith.constant 0 : i32
    %c0_i32_0 = arith.constant 0 : i32
    %c0_i32_1 = arith.constant 0 : i32
    return %c0_i32, %c0_i32_0 : i32, i32
  }
  func.func @transform_1(%arg0: i32) -> (i32, i32) {
    %c0_i32 = arith.constant 0 : i32
    %c0_i32_0 = arith.constant 0 : i32
    %c0_i32_1 = arith.constant 0 : i32
    return %c0_i32, %c0_i32_0 : i32, i32
  }
  func.func @transform_2(%arg0: i32) -> (i32, i32) {
    %c0_i32 = arith.constant 0 : i32
    %c0_i32_0 = arith.constant 0 : i32
    %c0_i32_1 = arith.constant 0 : i32
    return %c0_i32, %c0_i32_0 : i32, i32
  }
  func.func @transform_3(%arg0: i32) -> (i32, i32) {
    %c0_i32 = arith.constant 0 : i32
    %c0_i32_0 = arith.constant 0 : i32
    %c0_i32_1 = arith.constant 0 : i32
    return %c0_i32, %c0_i32_0 : i32, i32
  }
}

</mosaic_0001>

<bundles_post_ra>
// kernel: _forward_impl.1
= control target key start
LH: loop header
LB: loop body
LE: loop exit
PB: predicated region body
PF: predicated region fallthrough
CT: control target
= control target key end

     0   :  { %8 = vsyncpa [#allocation3], 0  ;;  %s1567_s0 = inlined_call_operand.vmem [shape: f32[8,40], index: 0, kind: input, shape index: {}]   ;;  %s1568_s1 = inlined_call_operand.hbm [shape: f32[176,128], index: 1, kind: input, shape index: {}]   ;;  %s1569_s2 = inlined_call_operand.hbm [shape: f32[144,128], index: 2, kind: input, shape index: {}]   ;;  %s1570_s3 = inlined_call_operand.vmem [shape: f32[32,128], index: 3, kind: output, shape index: {}]  }
   0x1   :  { %9 = vsyncpa [#allocation5], 0  ;;  %s1357_s12 = smov [#allocation2]   ;;  %s1309_s16 = scalar_lea.hbm %s1568_s1, 2816 }
   0x2   :  { %s17_s13 = sshll.u32 %s1357_s12, 4  ;;  %p1310_p0 = scmp.ne.s32.totalorder %s1568_s1, %s1309_s16  ;;  %s18_s13 = int_to_ptr.vmem [resolvable:$true] %s17_s13 }
   0x3   :  { %p1313_p1 = scmp.lt.u32.totalorder %s1309_s16, %s1568_s1 }
   0x5   :  { %p1315_p2 = pnand %p1313_p1, %p1310_p0 }
   0x7   :  { %1318 = shalt.err (!%p1315_p2)
}
   0x8   :  { %s1319_s21 = scalar_lea.vmem %s18_s13, 2816  ;;  %p1324_p4 = scmp.lt.s32.totalorder %s18_s13, %s18_s13 }
   0x9   :  { %p1320_p3 = scmp.ne.s32.totalorder %s18_s13, %s1319_s21  ;;  %p1325_p5 = scmp.lt.s32.totalorder %s1319_s21, %s1319_s21 }
   0xb   :  { %p1326_p6 = por %p1325_p5, %p1324_p4 }
   0xd   :  { %p1327_p7 = pnand %p1326_p6, %p1320_p3 }
   0xf   :  { %1330 = shalt.err (!%p1327_p7)
}
  0x10   :  { %s1358_s22 = smov 128   ;;  %s1359_s23 = smov 8  }
  0x11   :  { %23 = dma.hbm_to_vmem [thread:$0]  %s1568_s1, 2816, %s18_s13, [#allocation3], %s1358_s22, %s1358_s22, %s1359_s23  }
  0x12   :  { %s1360_s26 = smov [#allocation4]   ;;  %s1331_s30 = scalar_lea.hbm %s1569_s2, 2304 }
  0x13   :  { %s29_s27 = sshll.u32 %s1360_s26, 4  ;;  %p1332_p8 = scmp.ne.s32.totalorder %s1569_s2, %s1331_s30  ;;  %s30_s27 = int_to_ptr.vmem [resolvable:$true] %s29_s27 }
  0x14   :  { %p1335_p9 = scmp.lt.u32.totalorder %s1331_s30, %s1569_s2 }
  0x16   :  { %p1337_p10 = pnand %p1335_p9, %p1332_p8 }
  0x18   :  { %1340 = shalt.err (!%p1337_p10)
}
  0x19   :  { %s1341_s8 = scalar_lea.vmem %s30_s27, 2304  ;;  %p1346_p12 = scmp.lt.s32.totalorder %s30_s27, %s30_s27 }
  0x1a   :  { %p1342_p11 = scmp.ne.s32.totalorder %s30_s27, %s1341_s8  ;;  %p1347_p13 = scmp.lt.s32.totalorder %s1341_s8, %s1341_s8 }
  0x1c   :  { %p1348_p0 = por %p1347_p13, %p1346_p12 }
  0x1e   :  { %p1349_p1 = pnand %p1348_p0, %p1342_p11 }
  0x20   :  { %1352 = shalt.err (!%p1349_p1)
}
  0x21   :  { %35 = dma.hbm_to_vmem [thread:$0]  %s1569_s2, 2304, %s30_s27, [#allocation5], %s1358_s22, %s1358_s22, %s1359_s23  }
  0x22   :  { %1353 = dma.done.wait [#allocation3], 2816  }
  0x23   :  { %1354 = vsyncadd [#allocation3], 4294964480 }
  0x24   :  { %1355 = dma.done.wait [#allocation5], 2304  }
  0x25   :  { %1356 = vsyncadd [#allocation5], 4294964992  ;;  %v1361_v0 = vmov 0.0|0.0   ;;  %vm1362_vm0 = vmmov 0   ;;  %v1363_v1 = vmov 0.0   ;;  %v43_v2 = vld [vmem:[#allocation2] sm:$0xff]  ;;  %v65_v21 = vlaneseq }
  0x26   :  { %1213 = vmatprep.subr.bf16.mxu0 %v1361_v0  ;;  %1115 = vmatprep.mubr.msk.f32.mxu0 %vm1362_vm0, %v1363_v1  ;;  %v44_v3 = vld [vmem:[#allocation2 + $0x8] sm:$0xff]  ;;  %v45_v4 = vld [vmem:[#allocation2 + $0x10] sm:$0xff]  ;;  %v46_v6 = vld [vmem:[#allocation2 + $0x18] sm:$0xff]  ;;  %vm69_vm1 = vcmask 261120   ;;  %vm143_vm2 = vcmask 523264   ;;  %vm367_vm3 = vcmask 64512  }
  0x27   :  { %1219 = vmatprep.subr.bf16.mxu1 %v1361_v0  ;;  %1134 = vmatprep.mubr.msk.f32.mxu1 %vm1362_vm0, %v1363_v1  ;;  %v1214_v5 = vpack.c.bf16 %v44_v3, %v43_v2  ;;  %v1217_v7 = vpack.c.bf16 %v46_v6, %v45_v4  ;;  %v1423_v8 = vld [vmem:[%s1567_s0] sm:$0xff]  ;;  %v48_v10 = vld [vmem:[#allocation2 + $0x28] sm:$0xff]  ;;  %v49_v12 = vld [vmem:[#allocation2 + $0x30] sm:$0xff]  ;;  %v1435_v22 = vshrl.u32 %v65_v21, 7  ;;  %s1364_s0 = smov 24   ;;  %s1365_s11 = smov 96  }
  0x28   :  { %v47_v9 = vld [vmem:[#allocation2 + $0x20] sm:$0xff]  ;;  %v50_v13 = vld [vmem:[#allocation2 + $0x38] sm:$0xff]  ;;  %v52_v16 = vld [vmem:[#allocation2 + $0x48] sm:$0xff]  ;;  %s1366_s12 = smov 124   ;;  %s1367_s13 = smov 16   ;;  %vm473_vm14 = vcmask 15360  }
  0x29   :  { %1215 = vmatpush3.bf16.msra.mxu0 %v1214_v5  ;;  %v1220_v11 = vpack.c.bf16 %v48_v10, %v47_v9  ;;  %v1223_v14 = vpack.c.bf16 %v50_v13, %v49_v12  ;;  %v51_v15 = vld [vmem:[#allocation2 + $0x40] sm:$0xff]  ;;  %v53_v18 = vld [vmem:[#allocation2 + $0x50] sm:$0xff]  ;;  %v54_v19 = vld [vmem:[#allocation2 + $0x58] sm:$0xff]  ;;  %v67_v23 = vsub.s32 0, %v1435_v22  ;;  %v168_v48 = vsub.s32 1, %v1435_v22  ;;  %s1368_s14 = smov 32  }
  0x2a   :  { %1216 = vmatprep.subr.bf16.mxu0 %v1361_v0  ;;  %v1226_v17 = vpack.c.bf16 %v52_v16, %v51_v15  ;;  %v1229_v20 = vpack.c.bf16 %v54_v19, %v53_v18  ;;  %v1438_v24 = vld [vmem:[#allocation2 + $0xa8] sm:$0xff]  ;;  %v173_v49 = vsub.s32 2, %v1435_v22  ;;  %v55_v57 = vld [vmem:[#allocation2 + $0x60] sm:$0xff]  ;;  %v57_v60 = vld [vmem:[#allocation2 + $0x70] sm:$0xff]  ;;  %v179_v9 = vsub.s32 3, %v1435_v22 }
  0x2b   :  { %1221 = vmatpush3.bf16.msra.mxu1 %v1220_v11  ;;  %v68_v25 = vrot.slane %v1438_v24, %v67_v23  ;;  %v169_v50 = vrot.slane %v1438_v24, %v168_v48  ;;  %v56_v58 = vld [vmem:[#allocation2 + $0x68] sm:$0xff]  ;;  %v58_v61 = vld [vmem:[#allocation2 + $0x78] sm:$0xff]  ;;  %v59_v63 = vld [vmem:[#allocation2 + $0x80] sm:$0xff]  ;;  %vm475_vm15 = vcmask 31744  }
  0x2c   :  { %1222 = vmatprep.subr.bf16.mxu1 %v1361_v0  ;;  %v174_v53 = vrot.slane %v1438_v24, %v173_v49  ;;  %v1232_v59 = vpack.c.bf16 %v56_v58, %v55_v57  ;;  %v1235_v62 = vpack.c.bf16 %v58_v61, %v57_v60  ;;  %v60_v2 = vld [vmem:[#allocation2 + $0x88] sm:$0xff]  ;;  %v61_v4 = vld [vmem:[#allocation2 + $0x90] sm:$0xff]  ;;  %v62_v5 = vld [vmem:[#allocation2 + $0x98] sm:$0xff]  ;;  %v180_v10 = vrot.slane %v1438_v24, %v179_v9 }
  0x2d   :  { %1218 = vmatpush3.bf16.msra.mxu0 %v1217_v7  ;;  %v1238_v3 = vpack.c.bf16 %v60_v2, %v59_v63  ;;  %v1241_v6 = vpack.c.bf16 %v62_v5, %v61_v4  ;;  %v63_v7 = vld [vmem:[#allocation2 + $0xa0] sm:$0xff]  ;;  %v477_v61 = vld [vmem:[#allocation4] sm:$0xff] }
  0x2e   :  { %1231 = vmatprep.subr.bf16.mxu0 %v1361_v0 }
  0x2f   :  { %1224 = vmatpush3.bf16.msra.mxu1 %v1223_v14 }
  0x30   :  { %1116 = vmatmul.mubr.msk.f32.vlgmr.msra.gmra.mrb[0].mxu0 %vm69_vm1, %v1423_v8  ;;  %1225 = vmatprep.subr.bf16.mxu1 %v1361_v0 }
  0x31   :  { %1153 = vmatprep.mubr.msk.f32.mxu0 %vm1362_vm0, %v1363_v1  ;;  %1233 = vmatpush3.bf16.msra.mxu0 %v1232_v59 }
  0x32   :  { %1234 = vmatprep.subr.bf16.mxu0 %v1361_v0 }
  0x33   :  { %1227 = vmatpush3.bf16.msra.mxu1 %v1226_v17 }
  0x34   :  { %1228 = vmatprep.subr.bf16.mxu1 %v1361_v0 }
  0x35   :  { %1236 = vmatpush3.bf16.msra.mxu0 %v1235_v62 }
  0x36   :  { %1237 = vmatprep.subr.bf16.mxu0 %v1361_v0 }
  0x37   :  { %1230 = vmatpush3.bf16.msra.mxu1 %v1229_v20 }
  0x38   :  { %1156 = vmatprep.subr.mxu1 %v1363_v1 }
  0x39   :  { %1239 = vmatpush3.bf16.msra.mxu0 %v1238_v3 }
  0x3a   :  { %1240 = vmatprep.subr.bf16.mxu0 %v1361_v0 }
  0x3d   :  { %1242 = vmatpush3.bf16.msra.mxu0 %v1241_v6 }
 0x103   :  { %v139_v26 = vpop.f32.mrb[0].mxu0 }
 0x104   :  { %v140_v27 = vadd.f32 %v139_v26, %v68_v25  ;;  %v1117_v28 = vpop.f32.mrb[1].mxu0 }
 0x106   :  { %v144_v29 = vsel %vm143_vm2, %v140_v27, 0.0 }
 0x107   :  { %v145_v30 = vrot.slane %v144_v29, 4 }
 0x109   :  { %v146_v31 = vadd.f32 %v145_v30, %v144_v29 }
 0x10b   :  { %v147_v32 = vrot.slane %v146_v31, 2 }
 0x10d   :  { %v148_v33 = vadd.f32 %v147_v32, %v146_v31 }
 0x10f   :  { %v149_v34 = vrot.slane %v148_v33, 1 }
 0x111   :  { %v150_v35 = vadd.f32 %v149_v34, %v148_v33 }
 0x113   :  { %v152_v36 = vmul.f32 0.125, %v150_v35 }
 0x115   :  { %v153_v37 = vsub.f32 %v140_v27, %v152_v36  ;;  %v277_v36 = vsub.s32 4, %v1435_v22 }
 0x117   :  { %v154_v38 = vmul.f32 %v153_v37, %v153_v37 }
 0x119   :  { %v155_v39 = vsel %vm143_vm2, %v154_v38, 0.0  ;;  %v278_v38 = vrot.slane %v1438_v24, %v277_v36 }
 0x11a   :  { %v156_v40 = vrot.slane %v155_v39, 4 }
 0x11c   :  { %v157_v41 = vadd.f32 %v156_v40, %v155_v39 }
 0x11e   :  { %v158_v42 = vrot.slane %v157_v41, 2 }
 0x120   :  { %v159_v43 = vadd.f32 %v158_v42, %v157_v41 }
 0x122   :  { %v160_v44 = vrot.slane %v159_v43, 1 }
 0x124   :  { %v161_v45 = vadd.f32 %v160_v44, %v159_v43 }
 0x126   :  { %v162_v46 = vmul.f32 0.125, %v161_v45  ;;  %v288_v45 = vsub.s32 6, %v1435_v22 }
 0x128   :  { %v163_v47 = vadd.f32 1e-05, %v162_v46  ;;  %v289_v46 = vrot.slane %v1438_v24, %v288_v45 }
 0x12a   :  { %1287 = vrsqrt.f32 %v163_v47 }
 0x134   :  { %v1288_v51 = vpop.eup %1287 }
 0x135   :  { %v165_v52 = vmul.f32 %v1288_v51, %v153_v37  ;;  %v282_v37 = vsub.s32 5, %v1435_v22 }
 0x137   :  { %v170_v54 = vmul.f32 %v169_v50, %v165_v52  ;;  %v283_v41 = vrot.slane %v1438_v24, %v282_v37  ;;  %v365_v52 = vsub.s32 7, %v1435_v22 }
 0x139   :  { %v175_v55 = vadd.f32 %v174_v53, %v170_v54  ;;  %v366_v53 = vrot.slane %v1438_v24, %v365_v52  ;;  %v456_v24 = vand.u32 127, %v65_v21 }
 0x13b   :  { %v176_v56 = vmax.f32 %v175_v55, 0.0  ;;  %vm461_vm4 = vcmp.ge.s32.totalorder %v456_v24, 4  ;;  %vm462_vm5 = vcmp.lt.s32.totalorder %v456_v24, 6  ;;  %vm458_vm6 = vcmp.ge.s32.totalorder %v456_v24, 2 }
 0x13c   :  { %vm459_vm7 = vcmp.lt.s32.totalorder %v456_v24, 4  ;;  %vm457_vm8 = vcmp.lt.s32.totalorder %v456_v24, 2  ;;  %vm463_vm9 = vmand %vm461_vm4, %vm462_vm5  ;;  %vm464_vm11 = vcmp.ge.s32.totalorder %v456_v24, 6 }
 0x13d   :  { %1135 = vmatmul.mubr.msk.f32.vlgmr.msra.gmra.mrb[0].mxu1 %vm143_vm2, %v176_v56  ;;  %vm460_vm10 = vmand %vm458_vm6, %vm459_vm7 }
 0x13e   :  { %1158 = vmatprep.mubr.msk.f32.mxu1 %vm1362_vm0, %v1363_v1  ;;  %1157 = vmatpush3.msra.mxu1 %v63_v7  ;;  %vm465_vm12 = vmor %vm457_vm8, %vm463_vm9  ;;  %vm1008_vm0 = vcmask 130048  }
 0x13f   :  { %1161 = vmatprep.subr.mxu1 %v477_v61  ;;  %vm467_vm13 = vmor %vm460_vm10, %vm464_vm11 }
 0x210   :  { %v250_v11 = vpop.f32.mrb[0].mxu1 }
 0x211   :  { %v251_v12 = vadd.f32 %v250_v11, %v180_v10  ;;  %v1136_v13 = vpop.f32.mrb[1].mxu1  ;;  %v478_v11 = vld [vmem:[#allocation4 + $0x8] sm:$0xff] }
 0x213   :  { %v254_v14 = vsel %vm143_vm2, %v251_v12, 0.0 }
 0x214   :  { %v255_v15 = vrot.slane %v254_v14, 4 }
 0x216   :  { %v256_v16 = vadd.f32 %v255_v15, %v254_v14  ;;  %v480_v14 = vld [vmem:[#allocation4 + $0x18] sm:$0xff]  ;;  %v481_v15 = vld [vmem:[#allocation4 + $0x20] sm:$0xff] }
 0x218   :  { %v257_v0 = vrot.slane %v256_v16, 2 }
 0x21a   :  { %v258_v17 = vadd.f32 %v257_v0, %v256_v16  ;;  %v1247_v16 = vpack.c.bf16 %v481_v15, %v480_v14  ;;  %v483_v0 = vld [vmem:[#allocation4 + $0x30] sm:$0xff] }
 0x21c   :  { %v259_v18 = vrot.slane %v258_v17, 1 }
 0x21e   :  { %v260_v19 = vadd.f32 %v259_v18, %v258_v17  ;;  %v484_v18 = vld [vmem:[#allocation4 + $0x38] sm:$0xff] }
 0x220   :  { %v261_v20 = vmul.f32 0.125, %v260_v19  ;;  %v485_v19 = vld [vmem:[#allocation4 + $0x40] sm:$0xff] }
 0x222   :  { %v262_v25 = vsub.f32 %v251_v12, %v261_v20  ;;  %v479_v12 = vld [vmem:[#allocation4 + $0x10] sm:$0xff]  ;;  %v1255_v20 = vpack.c.bf16 %v485_v19, %v484_v18 }
 0x223   :  { %v1243_v13 = vpack.c.bf16 %v479_v12, %v478_v11 }
 0x224   :  { %v263_v26 = vmul.f32 %v262_v25, %v262_v25 }
 0x225   :  { %1244 = vmatprep.subr.bf16.mxu0 %v1243_v13 }
 0x226   :  { %v264_v27 = vsel %vm143_vm2, %v263_v26, 0.0 }
 0x227   :  { %v265_v28 = vrot.slane %v264_v27, 4 }
 0x229   :  { %v266_v29 = vadd.f32 %v265_v28, %v264_v27 }
 0x22b   :  { %v267_v30 = vrot.slane %v266_v29, 2 }
 0x22d   :  { %v268_v31 = vadd.f32 %v267_v30, %v266_v29 }
 0x22f   :  { %v269_v32 = vrot.slane %v268_v31, 1 }
 0x231   :  { %v270_v33 = vadd.f32 %v269_v32, %v268_v31 }
 0x233   :  { %v271_v34 = vmul.f32 0.125, %v270_v33 }
 0x235   :  { %v272_v35 = vadd.f32 1e-05, %v271_v34 }
 0x237   :  { %1289 = vrsqrt.f32 %v272_v35 }
 0x241   :  { %v1290_v39 = vpop.eup %1289 }
 0x242   :  { %v274_v40 = vmul.f32 %v1290_v39, %v262_v25  ;;  %v1488_v25 = vld [vmem:[#allocation4 + $0x88] sm:$0xff] }
 0x243   :  { %v498_v26 = vrot.slane %v1488_v25, %v67_v23 }
 0x244   :  { %v279_v42 = vmul.f32 %v278_v38, %v274_v40 }
 0x246   :  { %v284_v43 = vadd.f32 %v283_v41, %v279_v42 }
 0x248   :  { %v285_v44 = vmax.f32 %v284_v43, 0.0 }
 0x24a   :  { %1154 = vmatmul.mubr.msk.f32.vlgmr.msra.gmra.mrb[2].mxu0 %vm143_vm2, %v285_v44 }
 0x24b   :  { %1246 = vmatpush3.bf16.msra.mxu0 %v1243_v13  ;;  %v690_v13 = vrot.slane %v1488_v25, %v173_v49 }
 0x24c   :  { %1248 = vmatprep.subr.bf16.mxu0 %v1247_v16 }
 0x24f   :  { %1250 = vmatpush3.bf16.msra.mxu0 %v1247_v16 }
 0x31d   :  { %v359_v47 = vpop.f32.mrb[2].mxu0 }
 0x31e   :  { %v360_v50 = vadd.f32 %v359_v47, %v289_v46  ;;  %v1155_v51 = vpop.f32.mrb[3].mxu0 }
 0x320   :  { %1159 = vmatmul.mubr.msk.f32.vlgmr.msra.gmra.mrb[2].mxu1 %vm367_vm3, %v360_v50 }
 0x321   :  { %1162 = vmatpush3.msra.mxu1 %v477_v61 }
 0x3f3   :  { %v437_v54 = vpop.f32.mrb[2].mxu1 }
 0x3f4   :  { %v438_v55 = vadd.f32 %v437_v54, %v366_v53  ;;  %v1160_v56 = vpop.f32.mrb[3].mxu1 }
 0x3f6   :  { %v441_v57 = vmul.f32 0.5, %v438_v55 }
 0x3f8   :  { %v442_v58 = vmul.f32 1.442695, %v441_v57 }
 0x3fa   :  { %1291 = vpow2.f32 %v442_v58 }
 0x404   :  { %v1292_v59 = vpop.eup %1291 }
 0x405   :  { %v444_v60 = vadd.f32 1e-07, %v1292_v59 }
 0x407   :  { %446 = vrot.lane.b32.xlu0 %v444_v60, %s1364_s0 }
 0x479   :  { %v447_v62 = vpop.permute.xlu0 %446 }
 0x47a   :  { %v449_v63 = vmul.f32 %v447_v62, %v1423_v8 }
 0x47c   :  { %451 = vrot.lane.b32.xlu0 %v449_v63, %s1365_s11 }
 0x4ee   :  { %v452_v2 = vpop.permute.xlu0 %451 }
 0x4ef   :  { %v454_v3 = vadd.f32 %v452_v2, %v438_v55 }
 0x4f1   :  { %470 = vrot.lane.b32.xlu1 %v454_v3, %s1366_s12  ;;  %1163 = vmatprep.mubr.msk.f32.mxu1 %vm367_vm3, %v454_v3  ;;  %v466_v8 = vsel %vm465_vm12, 0.0, %v454_v3  ;;  %v468_v4 = vsel %vm467_vm13, 0.0, %v454_v3 }
 0x4f2   :  { %1164 = vmatmul.mubr.msk.f32.vlgmr.msra.gmra.mrb[4].mxu1 %vm367_vm3, %v466_v8 }
 0x4f3   :  { %1166 = vmatprep.mubr.msk.f32.mxu1 %vm367_vm3, %v468_v4 }
 0x4f5   :  { %1005 = vrot.lane.b32.xlu1 %v454_v3, %s1367_s13 }
 0x4f9   :  { %1014 = vrot.lane.b32.xlu1 %v1363_v1, %s1368_s14  ;;  %v482_v1 = vld [vmem:[#allocation4 + $0x28] sm:$0xff] }
 0x4fa   :  { %v1251_v17 = vpack.c.bf16 %v483_v0, %v482_v1 }
 0x4fc   :  { %1252 = vmatprep.subr.bf16.mxu0 %v1251_v17 }
 0x4fd   :  { %1254 = vmatpush3.bf16.msra.mxu0 %v1251_v17 }
 0x4fe   :  { %1256 = vmatprep.subr.bf16.mxu0 %v1255_v20 }
 0x501   :  { %1258 = vmatpush3.bf16.msra.mxu0 %v1255_v20 }
 0x563   :  { %v471_v21 = vpop.permute.xlu1 %470 }
 0x564   :  { %v474_v5 = vsel %vm473_vm14, 0.0, %v471_v21 }
 0x565   :  { %v476_v6 = vsel %vm475_vm15, %v474_v5, 0.0 }
 0x566   :  { %1167 = vmatmul.mubr.msk.f32.gmra.mrb[6].mxu1 %vm367_vm3, %v476_v6  ;;  %vm1022_vm3 = vcmask 457728  }
 0x567   :  { %v1006_v7 = vpop.permute.xlu1 %1005 }
 0x568   :  { %v1009_v10 = vsel %vm1008_vm0, %v438_v55, %v1006_v7 }
 0x569   :  { %1012 = vrot.lane.b32.xlu0 %v1009_v10, %s1368_s14  ;;  %v1500_v10 = vrot.slane %v1488_v25, %v168_v48 }
 0x5c5   :  { %v1165_v27 = vpop.f32.mrb[4].mxu1 }
 0x5c6   :  { %v582_v28 = vadd.f32 %v1165_v27, %v498_v26  ;;  %v576_v29 = vpop.f32.mrb[5].mxu1 }
 0x5c7   :  { %v577_v30 = vadd.f32 %v576_v29, %v498_v26 }
 0x5c8   :  { %v602_v31 = vsel %vm143_vm2, %v582_v28, 0.0 }
 0x5c9   :  { %v603_v32 = vrot.slane %v602_v31, 4  ;;  %v595_v33 = vsel %vm143_vm2, %v577_v30, 0.0 }
 0x5ca   :  { %v596_v34 = vrot.slane %v595_v33, 4 }
 0x5cb   :  { %v604_v35 = vadd.f32 %v603_v32, %v602_v31 }
 0x5cc   :  { %v597_v38 = vadd.f32 %v596_v34, %v595_v33 }
 0x5cd   :  { %v605_v39 = vrot.slane %v604_v35, 2 }
 0x5ce   :  { %v598_v40 = vrot.slane %v597_v38, 2 }
 0x5cf   :  { %v606_v41 = vadd.f32 %v605_v39, %v604_v35 }
 0x5d0   :  { %v599_v42 = vadd.f32 %v598_v40, %v597_v38 }
 0x5d1   :  { %v607_v43 = vrot.slane %v606_v41, 1 }
 0x5d2   :  { %v600_v44 = vrot.slane %v599_v42, 1 }
 0x5d3   :  { %v608_v46 = vadd.f32 %v607_v43, %v606_v41 }
 0x5d4   :  { %v601_v23 = vadd.f32 %v600_v44, %v599_v42 }
 0x5d5   :  { %v624_v47 = vmul.f32 0.125, %v608_v46 }
 0x5d6   :  { %v623_v50 = vmul.f32 0.125, %v601_v23 }
 0x5d7   :  { %v628_v51 = vsub.f32 %v582_v28, %v624_v47 }
 0x5d8   :  { %v627_v52 = vsub.f32 %v577_v30, %v623_v50 }
 0x5d9   :  { %v632_v53 = vmul.f32 %v628_v51, %v628_v51 }
 0x5da   :  { %v631_v54 = vmul.f32 %v627_v52, %v627_v52 }
 0x5db   :  { %v642_v55 = vsel %vm143_vm2, %v632_v53, 0.0 }
 0x5dc   :  { %v643_v56 = vrot.slane %v642_v55, 4  ;;  %v635_v57 = vsel %vm143_vm2, %v631_v54, 0.0 }
 0x5dd   :  { %v636_v58 = vrot.slane %v635_v57, 4 }
 0x5de   :  { %v644_v59 = vadd.f32 %v643_v56, %v642_v55 }
 0x5df   :  { %v637_v60 = vadd.f32 %v636_v58, %v635_v57 }
 0x5e0   :  { %v645_v61 = vrot.slane %v644_v59, 2 }
 0x5e1   :  { %v638_v62 = vrot.slane %v637_v60, 2 }
 0x5e2   :  { %v646_v63 = vadd.f32 %v645_v61, %v644_v59 }
 0x5e3   :  { %v639_v24 = vadd.f32 %v638_v62, %v637_v60 }
 0x5e4   :  { %v647_v2 = vrot.slane %v646_v63, 1 }
 0x5e5   :  { %v640_v3 = vrot.slane %v639_v24, 1 }
 0x5e6   :  { %v648_v8 = vadd.f32 %v647_v2, %v646_v63 }
 0x5e7   :  { %v641_v4 = vadd.f32 %v640_v3, %v639_v24 }
 0x5e8   :  { %v664_v21 = vmul.f32 0.125, %v648_v8 }
 0x5e9   :  { %v663_v5 = vmul.f32 0.125, %v641_v4 }
 0x5ea   :  { %v668_v6 = vadd.f32 1e-05, %v664_v21 }
 0x5eb   :  { %v667_v7 = vadd.f32 1e-05, %v663_v5 }
 0x5ec   :  { %1293 = vrsqrt.f32 %v668_v6 }
 0x5ed   :  { %1295 = vrsqrt.f32 %v667_v7 }
 0x5f6   :  { %v1294_v11 = vpop.eup %1293 }
 0x5f7   :  { %v1296_v12 = vpop.eup %1295  ;;  %v676_v14 = vmul.f32 %v1294_v11, %v628_v51 }
 0x5f8   :  { %v675_v15 = vmul.f32 %v1296_v12, %v627_v52 }
 0x5f9   :  { %v684_v16 = vmul.f32 %v1500_v10, %v676_v14 }
 0x5fa   :  { %v683_v1 = vmul.f32 %v1500_v10, %v675_v15 }
 0x5fb   :  { %v692_v0 = vadd.f32 %v690_v13, %v684_v16 }
 0x5fc   :  { %v691_v17 = vadd.f32 %v690_v13, %v683_v1 }
 0x5fd   :  { %v696_v19 = vmax.f32 %v692_v0, 0.0  ;;  %v486_v0 = vld [vmem:[#allocation4 + $0x48] sm:$0xff] }
 0x5fe   :  { %v695_v18 = vmax.f32 %v691_v17, 0.0  ;;  %v487_v17 = vld [vmem:[#allocation4 + $0x50] sm:$0xff] }
 0x600   :  { %1185 = vmatprep.mubr.msk.f32.mxu0 %vm143_vm2, %v695_v18  ;;  %v1259_v18 = vpack.c.bf16 %v487_v17, %v486_v0 }
 0x601   :  { %1186 = vmatmul.mubr.msk.f32.vlgmr.msra.gmra.mrb[4].mxu0 %vm143_vm2, %v696_v19  ;;  %v488_v19 = vld [vmem:[#allocation4 + $0x58] sm:$0xff] }
 0x602   :  { %1260 = vmatprep.subr.bf16.mxu1 %v1259_v18 }
 0x603   :  { %1262 = vmatpush3.bf16.msra.mxu1 %v1259_v18 }
 0x639   :  { %v1168_v48 = vpop.f32.mrb[6].mxu1 }
 0x63a   :  { %v592_v20 = vadd.f32 %v1168_v48, %v498_v26  ;;  %v586_v27 = vpop.f32.mrb[7].mxu1  ;;  %v489_v48 = vld [vmem:[#allocation4 + $0x60] sm:$0xff] }
 0x63b   :  { %v587_v28 = vadd.f32 %v586_v27, %v498_v26  ;;  %v490_v27 = vld [vmem:[#allocation4 + $0x68] sm:$0xff] }
 0x63c   :  { %v616_v49 = vsel %vm143_vm2, %v592_v20, 0.0 }
 0x63d   :  { %v617_v29 = vrot.slane %v616_v49, 4  ;;  %v609_v30 = vsel %vm143_vm2, %v587_v28, 0.0 }
 0x63e   :  { %v610_v31 = vrot.slane %v609_v30, 4 }
 0x63f   :  { %v618_v32 = vadd.f32 %v617_v29, %v616_v49  ;;  %v493_v49 = vld [vmem:[#allocation4 + $0x80] sm:$0xff] }
 0x640   :  { %v611_v33 = vadd.f32 %v610_v31, %v609_v30  ;;  %v702_v30 = vrot.slane %v1488_v25, %v179_v9 }
 0x641   :  { %v619_v34 = vrot.slane %v618_v32, 2 }
 0x642   :  { %v612_v35 = vrot.slane %v611_v33, 2 }
 0x643   :  { %v620_v38 = vadd.f32 %v619_v34, %v618_v32 }
 0x644   :  { %v613_v39 = vadd.f32 %v612_v35, %v611_v33 }
 0x645   :  { %v621_v40 = vrot.slane %v620_v38, 1 }
 0x646   :  { %v614_v41 = vrot.slane %v613_v39, 1 }
 0x647   :  { %v622_v42 = vadd.f32 %v621_v40, %v620_v38 }
 0x648   :  { %v615_v43 = vadd.f32 %v614_v41, %v613_v39 }
 0x649   :  { %v626_v44 = vmul.f32 0.125, %v622_v42 }
 0x64a   :  { %v625_v46 = vmul.f32 0.125, %v615_v43 }
 0x64b   :  { %v630_v23 = vsub.f32 %v592_v20, %v626_v44  ;;  %v1263_v20 = vpack.c.bf16 %v489_v48, %v488_v19 }
 0x64c   :  { %v629_v26 = vsub.f32 %v587_v28, %v625_v46 }
 0x64d   :  { %v634_v47 = vmul.f32 %v630_v23, %v630_v23  ;;  %1264 = vmatprep.subr.bf16.mxu1 %v1263_v20 }
 0x64e   :  { %v633_v50 = vmul.f32 %v629_v26, %v629_v26  ;;  %1266 = vmatpush3.bf16.msra.mxu1 %v1263_v20 }
 0x64f   :  { %v656_v51 = vsel %vm143_vm2, %v634_v47, 0.0 }
 0x650   :  { %v657_v52 = vrot.slane %v656_v51, 4  ;;  %v649_v53 = vsel %vm143_vm2, %v633_v50, 0.0 }
 0x651   :  { %v650_v54 = vrot.slane %v649_v53, 4 }
 0x652   :  { %v658_v55 = vadd.f32 %v657_v52, %v656_v51 }
 0x653   :  { %v651_v56 = vadd.f32 %v650_v54, %v649_v53 }
 0x654   :  { %v659_v57 = vrot.slane %v658_v55, 2 }
 0x655   :  { %v652_v58 = vrot.slane %v651_v56, 2 }
 0x656   :  { %v660_v59 = vadd.f32 %v659_v57, %v658_v55 }
 0x657   :  { %v653_v60 = vadd.f32 %v652_v58, %v651_v56 }
 0x658   :  { %v661_v61 = vrot.slane %v660_v59, 1 }
 0x659   :  { %v654_v62 = vrot.slane %v653_v60, 1 }
 0x65a   :  { %v662_v63 = vadd.f32 %v661_v61, %v660_v59 }
 0x65b   :  { %v655_v24 = vadd.f32 %v654_v62, %v653_v60 }
 0x65c   :  { %v666_v2 = vmul.f32 0.125, %v662_v63 }
 0x65d   :  { %v665_v3 = vmul.f32 0.125, %v655_v24 }
 0x65e   :  { %v670_v8 = vadd.f32 1e-05, %v666_v2 }
 0x65f   :  { %v669_v4 = vadd.f32 1e-05, %v665_v3 }
 0x660   :  { %1297 = vrsqrt.f32 %v670_v8 }
 0x661   :  { %1299 = vrsqrt.f32 %v669_v4 }
 0x66a   :  { %v1298_v21 = vpop.eup %1297 }
 0x66b   :  { %v1300_v5 = vpop.eup %1299  ;;  %v678_v6 = vmul.f32 %v1298_v21, %v630_v23 }
 0x66c   :  { %v677_v7 = vmul.f32 %v1300_v5, %v629_v26 }
 0x66d   :  { %v686_v11 = vmul.f32 %v1500_v10, %v678_v6 }
 0x66e   :  { %v685_v12 = vmul.f32 %v1500_v10, %v677_v7  ;;  %v491_v10 = vld [vmem:[#allocation4 + $0x70] sm:$0xff] }
 0x66f   :  { %v694_v14 = vadd.f32 %v690_v13, %v686_v11  ;;  %v1267_v28 = vpack.c.bf16 %v491_v10, %v490_v27 }
 0x670   :  { %v693_v15 = vadd.f32 %v690_v13, %v685_v12  ;;  %v492_v13 = vld [vmem:[#allocation4 + $0x78] sm:$0xff] }
 0x671   :  { %v698_v1 = vmax.f32 %v694_v14, 0.0  ;;  %1268 = vmatprep.subr.bf16.mxu1 %v1267_v28  ;;  %v1271_v29 = vpack.c.bf16 %v493_v49, %v492_v13  ;;  %v1527_v14 = vrot.slane %v1488_v25, %v277_v36 }
 0x672   :  { %v697_v16 = vmax.f32 %v693_v15, 0.0  ;;  %1270 = vmatpush3.bf16.msra.mxu1 %v1267_v28 }
 0x673   :  { %1272 = vmatprep.subr.bf16.mxu1 %v1271_v29 }
 0x674   :  { %1188 = vmatprep.mubr.msk.f32.mxu0 %vm143_vm2, %v697_v16 }
 0x675   :  { %1189 = vmatmul.mubr.msk.f32.gmra.mrb[6].mxu0 %vm143_vm2, %v698_v1  ;;  %v895_v1 = vrot.slane %v1488_v25, %v282_v37 }
 0x676   :  { %1274 = vmatpush3.bf16.msra.mxu1 %v1271_v29 }
 0x6d4   :  { %v1187_v31 = vpop.f32.mrb[4].mxu0 }
 0x6d5   :  { %v787_v32 = vadd.f32 %v1187_v31, %v702_v30  ;;  %v781_v33 = vpop.f32.mrb[5].mxu0 }
 0x6d6   :  { %v782_v34 = vadd.f32 %v781_v33, %v702_v30 }
 0x6d7   :  { %v807_v35 = vsel %vm143_vm2, %v787_v32, 0.0 }
 0x6d8   :  { %v808_v38 = vrot.slane %v807_v35, 4  ;;  %v800_v39 = vsel %vm143_vm2, %v782_v34, 0.0 }
 0x6d9   :  { %v801_v40 = vrot.slane %v800_v39, 4 }
 0x6da   :  { %v809_v41 = vadd.f32 %v808_v38, %v807_v35 }
 0x6db   :  { %v802_v42 = vadd.f32 %v801_v40, %v800_v39 }
 0x6dc   :  { %v810_v43 = vrot.slane %v809_v41, 2 }
 0x6dd   :  { %v803_v44 = vrot.slane %v802_v42, 2 }
 0x6de   :  { %v811_v46 = vadd.f32 %v810_v43, %v809_v41 }
 0x6df   :  { %v804_v23 = vadd.f32 %v803_v44, %v802_v42 }
 0x6e0   :  { %v812_v26 = vrot.slane %v811_v46, 1 }
 0x6e1   :  { %v805_v47 = vrot.slane %v804_v23, 1 }
 0x6e2   :  { %v813_v50 = vadd.f32 %v812_v26, %v811_v46 }
 0x6e3   :  { %v806_v9 = vadd.f32 %v805_v47, %v804_v23 }
 0x6e4   :  { %v829_v51 = vmul.f32 0.125, %v813_v50 }
 0x6e5   :  { %v828_v52 = vmul.f32 0.125, %v806_v9 }
 0x6e6   :  { %v833_v53 = vsub.f32 %v787_v32, %v829_v51 }
 0x6e7   :  { %v832_v54 = vsub.f32 %v782_v34, %v828_v52 }
 0x6e8   :  { %v837_v55 = vmul.f32 %v833_v53, %v833_v53 }
 0x6e9   :  { %v836_v56 = vmul.f32 %v832_v54, %v832_v54 }
 0x6ea   :  { %v847_v57 = vsel %vm143_vm2, %v837_v55, 0.0 }
 0x6eb   :  { %v848_v58 = vrot.slane %v847_v57, 4  ;;  %v840_v59 = vsel %vm143_vm2, %v836_v56, 0.0 }
 0x6ec   :  { %v841_v60 = vrot.slane %v840_v59, 4 }
 0x6ed   :  { %v849_v61 = vadd.f32 %v848_v58, %v847_v57 }
 0x6ee   :  { %v842_v62 = vadd.f32 %v841_v60, %v840_v59 }
 0x6ef   :  { %v850_v63 = vrot.slane %v849_v61, 2 }
 0x6f0   :  { %v843_v24 = vrot.slane %v842_v62, 2 }
 0x6f1   :  { %v851_v2 = vadd.f32 %v850_v63, %v849_v61 }
 0x6f2   :  { %v844_v3 = vadd.f32 %v843_v24, %v842_v62 }
 0x6f3   :  { %v852_v8 = vrot.slane %v851_v2, 1 }
 0x6f4   :  { %v845_v4 = vrot.slane %v844_v3, 1 }
 0x6f5   :  { %v853_v21 = vadd.f32 %v852_v8, %v851_v2 }
 0x6f6   :  { %v846_v5 = vadd.f32 %v845_v4, %v844_v3 }
 0x6f7   :  { %v869_v6 = vmul.f32 0.125, %v853_v21 }
 0x6f8   :  { %v868_v7 = vmul.f32 0.125, %v846_v5 }
 0x6f9   :  { %v873_v11 = vadd.f32 1e-05, %v869_v6 }
 0x6fa   :  { %v872_v12 = vadd.f32 1e-05, %v868_v7 }
 0x6fb   :  { %1301 = vrsqrt.f32 %v873_v11 }
 0x6fc   :  { %1303 = vrsqrt.f32 %v872_v12 }
 0x705   :  { %v1302_v15 = vpop.eup %1301 }
 0x706   :  { %v1304_v16 = vpop.eup %1303  ;;  %v881_v0 = vmul.f32 %v1302_v15, %v833_v53 }
 0x707   :  { %v880_v17 = vmul.f32 %v1304_v16, %v832_v54 }
 0x708   :  { %v889_v18 = vmul.f32 %v1527_v14, %v881_v0 }
 0x709   :  { %v888_v19 = vmul.f32 %v1527_v14, %v880_v17  ;;  %v907_v17 = vrot.slane %v1488_v25, %v288_v45 }
 0x70a   :  { %v897_v48 = vadd.f32 %v895_v1, %v889_v18 }
 0x70b   :  { %v896_v20 = vadd.f32 %v895_v1, %v888_v19  ;;  %v1015_v19 = vpop.permute.xlu1 %1014 }
 0x70c   :  { %v901_v10 = vmax.f32 %v897_v48, 0.0 }
 0x70d   :  { %v900_v27 = vmax.f32 %v896_v20, 0.0 }
 0x70f   :  { %1207 = vmatprep.mubr.msk.f32.mxu1 %vm143_vm2, %v900_v27 }
 0x710   :  { %1208 = vmatmul.mubr.msk.f32.vlgmr.msra.gmra.mrb[8].mxu1 %vm143_vm2, %v901_v10  ;;  %v1013_v10 = vpop.permute.xlu0 %1012 }
 0x748   :  { %v1190_v36 = vpop.f32.mrb[6].mxu0 }
 0x749   :  { %v797_v28 = vadd.f32 %v1190_v36, %v702_v30  ;;  %v791_v13 = vpop.f32.mrb[7].mxu0 }
 0x74a   :  { %v792_v49 = vadd.f32 %v791_v13, %v702_v30 }
 0x74b   :  { %v821_v37 = vsel %vm143_vm2, %v797_v28, 0.0 }
 0x74c   :  { %v822_v29 = vrot.slane %v821_v37, 4  ;;  %v814_v31 = vsel %vm143_vm2, %v792_v49, 0.0 }
 0x74d   :  { %v815_v32 = vrot.slane %v814_v31, 4 }
 0x74e   :  { %v823_v33 = vadd.f32 %v822_v29, %v821_v37 }
 0x74f   :  { %v816_v34 = vadd.f32 %v815_v32, %v814_v31 }
 0x750   :  { %v824_v35 = vrot.slane %v823_v33, 2 }
 0x751   :  { %v817_v38 = vrot.slane %v816_v34, 2 }
 0x752   :  { %v825_v39 = vadd.f32 %v824_v35, %v823_v33 }
 0x753   :  { %v818_v40 = vadd.f32 %v817_v38, %v816_v34 }
 0x754   :  { %v826_v41 = vrot.slane %v825_v39, 1 }
 0x755   :  { %v819_v42 = vrot.slane %v818_v40, 1 }
 0x756   :  { %v827_v43 = vadd.f32 %v826_v41, %v825_v39 }
 0x757   :  { %v820_v44 = vadd.f32 %v819_v42, %v818_v40 }
 0x758   :  { %v831_v46 = vmul.f32 0.125, %v827_v43 }
 0x759   :  { %v830_v23 = vmul.f32 0.125, %v820_v44 }
 0x75a   :  { %v835_v26 = vsub.f32 %v797_v28, %v831_v46 }
 0x75b   :  { %v834_v30 = vsub.f32 %v792_v49, %v830_v23 }
 0x75c   :  { %v839_v47 = vmul.f32 %v835_v26, %v835_v26 }
 0x75d   :  { %v838_v50 = vmul.f32 %v834_v30, %v834_v30 }
 0x75e   :  { %v861_v9 = vsel %vm143_vm2, %v839_v47, 0.0 }
 0x75f   :  { %v862_v51 = vrot.slane %v861_v9, 4  ;;  %v854_v52 = vsel %vm143_vm2, %v838_v50, 0.0 }
 0x760   :  { %v855_v53 = vrot.slane %v854_v52, 4 }
 0x761   :  { %v863_v54 = vadd.f32 %v862_v51, %v861_v9 }
 0x762   :  { %v856_v55 = vadd.f32 %v855_v53, %v854_v52 }
 0x763   :  { %v864_v56 = vrot.slane %v863_v54, 2 }
 0x764   :  { %v857_v57 = vrot.slane %v856_v55, 2 }
 0x765   :  { %v865_v58 = vadd.f32 %v864_v56, %v863_v54 }
 0x766   :  { %v858_v59 = vadd.f32 %v857_v57, %v856_v55 }
 0x767   :  { %v866_v60 = vrot.slane %v865_v58, 1 }
 0x768   :  { %v859_v61 = vrot.slane %v858_v59, 1 }
 0x769   :  { %v867_v62 = vadd.f32 %v866_v60, %v865_v58 }
 0x76a   :  { %v860_v63 = vadd.f32 %v859_v61, %v858_v59 }
 0x76b   :  { %v871_v24 = vmul.f32 0.125, %v867_v62 }
 0x76c   :  { %v870_v2 = vmul.f32 0.125, %v860_v63 }
 0x76d   :  { %v875_v3 = vadd.f32 1e-05, %v871_v24 }
 0x76e   :  { %v874_v8 = vadd.f32 1e-05, %v870_v2 }
 0x76f   :  { %1305 = vrsqrt.f32 %v875_v3 }
 0x770   :  { %1307 = vrsqrt.f32 %v874_v8 }
 0x779   :  { %v1306_v4 = vpop.eup %1305 }
 0x77a   :  { %v1308_v21 = vpop.eup %1307  ;;  %v883_v5 = vmul.f32 %v1306_v4, %v835_v26 }
 0x77b   :  { %v882_v6 = vmul.f32 %v1308_v21, %v834_v30 }
 0x77c   :  { %v891_v7 = vmul.f32 %v1527_v14, %v883_v5 }
 0x77d   :  { %v890_v11 = vmul.f32 %v1527_v14, %v882_v6 }
 0x77e   :  { %v899_v12 = vadd.f32 %v895_v1, %v891_v7 }
 0x77f   :  { %v898_v15 = vadd.f32 %v895_v1, %v890_v11 }
 0x780   :  { %v903_v0 = vmax.f32 %v899_v12, 0.0 }
 0x781   :  { %v902_v16 = vmax.f32 %v898_v15, 0.0 }
 0x783   :  { %1210 = vmatprep.mubr.msk.f32.mxu1 %vm143_vm2, %v902_v16 }
 0x784   :  { %1211 = vmatmul.mubr.msk.f32.gmra.mrb[10].mxu1 %vm143_vm2, %v903_v0 }
 0x7e3   :  { %v1209_v18 = vpop.f32.mrb[8].mxu1 }
 0x7e4   :  { %v992_v48 = vadd.f32 %v1209_v18, %v907_v17  ;;  %v986_v20 = vpop.f32.mrb[9].mxu1 }
 0x7e5   :  { %v987_v27 = vadd.f32 %v986_v20, %v907_v17 }
 0x7e6   :  { %v1019_v14 = vsel %vm69_vm1, %v992_v48, %v1015_v19 }
 0x7e7   :  { %v1018_v1 = vsel %vm69_vm1, %v987_v27, %v1013_v10  ;;  %v1024_v36 = vsel %vm1022_vm3, %v1019_v14, 0.0 }
 0x7e8   :  { %v1023_v28 = vsel %vm1022_vm3, %v1018_v1, 0.0  ;;  %1028 = vst [vmem:[%s1570_s3 + $0x8] sm:$0xff] %v1024_v36 }
 0x7e9   :  { %1027 = vst [vmem:[%s1570_s3] sm:$0xff] %v1023_v28 }
 0x857   :  { %v1212_v22 = vpop.f32.mrb[10].mxu1 }
 0x858   :  { %v1002_v45 = vadd.f32 %v1212_v22, %v907_v17  ;;  %v996_v25 = vpop.f32.mrb[11].mxu1 }
 0x859   :  { %v997_v13 = vadd.f32 %v996_v25, %v907_v17 }
 0x85a   :  { %v1021_v49 = vsel %vm69_vm1, %v1002_v45, %v1015_v19 }
 0x85b   :  { %v1026_v37 = vsel %vm1022_vm3, %v1021_v49, 0.0  ;;  %v1020_v29 = vsel %vm69_vm1, %v997_v13, %v1015_v19 }
 0x85c   :  { %1030 = vst [vmem:[%s1570_s3 + $0x18] sm:$0xff] %v1026_v37  ;;  %v1025_v31 = vsel %vm1022_vm3, %v1020_v29, 0.0 }
 0x85d   :  { %1029 = vst [vmem:[%s1570_s3 + $0x10] sm:$0xff] %v1025_v31 }
 0x85e   :  { %1035 = vsyncpa [#allocation3], 1 }
 0x85f   :  { %1036 = vsyncpa [#allocation5], 1 }

</bundles_post_ra>
